<compile_context>
chip_gen: v5e
topology: v5e:2x2
jax: 0.10.0
libtpu: 0.0.40
codegen_flags: <defaults>
</compile_context>

<pallas_src>
import jax
import jax.numpy as jnp
from jax.experimental import pallas as pl
from jax.experimental.pallas import tpu as pltpu

FREQ_DIM = 256       # FrequencyFeatureExtractor output dim (fixed in the module)
SEM_DIM = 768        # CLIPCLSExtractor.hidden_dim (ViT-B CLS width)
HIDDEN_DIM = 256
NUM_HEADS = 4        # kept for documentation; attention collapses for 1 kv token
NUM_CLASSES = 2
CLS_HIDDEN = 128     # classifier hidden width
OUT_ROWS = 8         # sublane-padded logit rows in the transposed output slab

TB_MAX = 2048        # max batch-tile rows
MIN_SPLIT_TILE = 512 # once a split tile would still be >=512 rows, use >=2 tiles


# ---------------------------------------------------------------------------
# Pallas kernel: the entire fusion head after offline folding.
#   h       = relu(freq @ W_eff + b_eff)            (TB, 128)
#   logitsT = W2^T @ h^T + b2^T                     (8, TB)  lane-dense store
# Two MXU matmuls per batch tile; weights stay VMEM-resident across the grid.
# ---------------------------------------------------------------------------
def _gxma_head_kernel(freq_ref, w_eff_ref, b_eff_ref, w2t_ref, b2t_ref, out_ref):
    # freq arrives pre-rounded to bf16 (done in the wrapper — identical to the
    # old in-kernel cast but with half the HBM input bytes).
    h = jnp.dot(freq_ref[...], w_eff_ref[...],
                preferred_element_type=jnp.float32) + b_eff_ref[...]      # (TB, 128)
    h = jnp.maximum(h, 0.0).astype(jnp.bfloat16)

    # logits^T via "contract last dims" (trans_b form): (8,128) x (TB,128)^T.
    # No explicit transpose of the big activation; result is already the
    # transposed, lane-dense layout we store.
    logits_t = jax.lax.dot_general(
        w2t_ref[...], h,
        dimension_numbers=(((1,), (1,)), ((), ())),
        preferred_element_type=jnp.float32)                               # (8, TB)
    out_ref[...] = logits_t + b2t_ref[...]


def _round_up(x, m):
    return ((x + m - 1) // m) * m


def gxma_fusion_head(freq_feat, kp):
    """freq_feat: (B, FREQ_DIM) -> logits (B, NUM_CLASSES) f32."""
    B = freq_feat.shape[0]

    # bf16 input stream (kernel is HBM-bound; this is numerically identical to
    # the previous in-kernel bf16 rounding).
    freq_feat = freq_feat.astype(jnp.bfloat16)

    # Batch tile: multiple of 128 (bf16 sublane pack + lane-dense transposed
    # output), large enough to amortize the ~0.35 us/step overhead, and >=2
    # tiles for big batches so both v7x TensorCores get work.
    B_aligned = _round_up(max(B, 1), 128)
    if B_aligned >= 2 * MIN_SPLIT_TILE:
        TB = min(TB_MAX, _round_up((B_aligned + 1) // 2, 128))
    else:
        TB = B_aligned
    n_tiles = (B_aligned + TB - 1) // TB
    B_pad = n_tiles * TB
    if B_pad != B:
        freq_feat = jnp.pad(freq_feat, ((0, B_pad - B), (0, 0)))

    # NOTE: for tiny inference batches it can be cheaper to let XLA fuse the two
    # dots into the FFT epilogue instead of launching a pallas_call; the Pallas
    # path is kept unconditionally here so the kernel is always exercised.
    out_t = pl.pallas_call(
        _gxma_head_kernel,
        out_shape=jax.ShapeDtypeStruct((OUT_ROWS, B_pad), jnp.float32),
        grid=(n_tiles,),
        in_specs=[
            pl.BlockSpec((TB, FREQ_DIM), lambda i: (i, 0)),            # freq (streamed)
            pl.BlockSpec((FREQ_DIM, CLS_HIDDEN), lambda i: (0, 0)),    # W_eff (resident)
            pl.BlockSpec((1, CLS_HIDDEN), lambda i: (0, 0)),           # b_eff
            pl.BlockSpec((OUT_ROWS, CLS_HIDDEN), lambda i: (0, 0)),    # W2^T (padded rows)
            pl.BlockSpec((OUT_ROWS, 1), lambda i: (0, 0)),             # b2^T (padded rows)
        ],
        out_specs=pl.BlockSpec((OUT_ROWS, TB), lambda i: (0, i)),
        compiler_params=pltpu.CompilerParams(
            dimension_semantics=("parallel",)),
    )(freq_feat, kp["w_eff"], kp["b_eff"], kp["w2t"], kp["b2t"])

    # (8, B_pad) transposed slab -> (B, NUM_CLASSES)
    return out_t[:NUM_CLASSES, :B].T


# ---------------------------------------------------------------------------
# Glue (plain JAX): stand-in feature extractors + deterministic parameter init.
# ---------------------------------------------------------------------------
def clip_cls_extractor(images, w_sem):
    # TODO(synk): the real CLIPCLSExtractor wraps a pretrained CLIP ViT backbone
    # which cannot be reproduced here; deterministic stand-in producing the
    # (B, SEM_DIM) CLS feature via a fixed projection of the flattened image.
    # With a single query/key token the semantic branch cannot affect the
    # logits (same property as the PyTorch module).
    B = images.shape[0]
    flat = images.reshape(B, -1).astype(jnp.float32)
    return jnp.tanh(flat @ w_sem)


def frequency_feature_extractor(images):
    # TODO(synk): FrequencyFeatureExtractor source not provided; deterministic
    # stand-in: 2-D FFT log-magnitude fingerprint of the channel-mean image,
    # flattened to FREQ_DIM values (vectorized over the batch, equivalent to
    # the per-image .cpu() loop + torch.stack in the reference forward).
    gray = images.astype(jnp.float32).mean(axis=1)             # (B, H, W)
    spec = jnp.log1p(jnp.abs(jnp.fft.fft2(gray)))              # (B, H, W)
    B = images.shape[0]
    feat = spec.reshape(B, -1)
    return feat[:, :FREQ_DIM].astype(jnp.float32)


def init_params(key):
    ks = jax.random.split(key, 16)

    def lin(k, fan_in, fan_out):
        # Deterministic init; weights stored already transposed to (in, out),
        # biases stored as (1, out).
        kw, kb = jax.random.split(k)
        w = jax.random.normal(kw, (fan_in, fan_out), jnp.float32) / jnp.sqrt(
            jnp.float32(fan_in))
        b = 0.01 * jax.random.normal(kb, (1, fan_out), jnp.float32)
        return w, b

    p = {}
    # Query/key path parameters exist in the PyTorch module but are provably
    # dead for the logits (softmax over one key == 1); kept for completeness.
    p["wq"], p["bq"] = lin(ks[0], SEM_DIM, HIDDEN_DIM)       # query_proj (dead)
    p["wk"], p["bk"] = lin(ks[1], FREQ_DIM, HIDDEN_DIM)      # key_proj   (dead)
    p["wv"], p["bv"] = lin(ks[2], FREQ_DIM, HIDDEN_DIM)      # value_proj
    p["wiq"], p["biq"] = lin(ks[3], HIDDEN_DIM, HIDDEN_DIM)  # MHA in_proj q (dead)
    p["wik"], p["bik"] = lin(ks[4], HIDDEN_DIM, HIDDEN_DIM)  # MHA in_proj k (dead)
    p["wiv"], p["biv"] = lin(ks[5], HIDDEN_DIM, HIDDEN_DIM)  # MHA in_proj v
    p["wo"], p["bo"] = lin(ks[6], HIDDEN_DIM, HIDDEN_DIM)    # MHA out_proj
    p["w1"], p["b1"] = lin(ks[7], HIDDEN_DIM, CLS_HIDDEN)    # classifier[0]
    p["w2"], p["b2"] = lin(ks[8], CLS_HIDDEN, NUM_CLASSES)   # classifier[2]
    # Stand-in CLIP projection (glue only, not a module parameter).
    p["w_sem"] = jax.random.normal(ks[9], (3 * 16 * 16, SEM_DIM),
                                   jnp.float32) / jnp.sqrt(jnp.float32(3 * 16 * 16))
    return p


def fold_params(p):
    """Fold the purely-linear chain value_proj -> in_proj_v -> out_proj ->
    classifier[0] into one (FREQ_DIM, CLS_HIDDEN) weight + bias, and store
    classifier[2] transposed and row-padded to OUT_ROWS for the lane-dense
    transposed output.  Mathematically equivalent to the unfused f32 chain up
    to bf16 rounding of the folded weights (validated in __main__)."""
    w_eff = p["wv"] @ p["wiv"] @ p["wo"] @ p["w1"]                        # (256, 128)
    b_eff = ((p["bv"] @ p["wiv"] + p["biv"]) @ p["wo"] + p["bo"]) @ p["w1"] + p["b1"]
    w2t = jnp.zeros((OUT_ROWS, CLS_HIDDEN), jnp.float32).at[:NUM_CLASSES, :].set(
        p["w2"].T)                                                         # (8, 128)
    b2t = jnp.zeros((OUT_ROWS, 1), jnp.float32).at[:NUM_CLASSES, 0].set(
        p["b2"][0])                                                        # (8, 1)
    return {
        "w_eff": w_eff.astype(jnp.bfloat16),
        "b_eff": b_eff.astype(jnp.float32),
        "w2t": w2t.astype(jnp.bfloat16),
        "b2t": b2t,
    }


def reference_head(freq_feat, sem_feat, p):
    """Unfused f32 reference of CrossAttentionFusion + classifier (eval mode).
    With one query and one key token, softmax over the length-1 key axis is 1,
    so per-head attention output == projected value and q/k drop out."""
    _q = sem_feat @ p["wq"] + p["bq"]          # dead w.r.t. the logits
    _k = freq_feat @ p["wk"] + p["bk"]         # dead w.r.t. the logits
    v = freq_feat @ p["wv"] + p["bv"]
    _qi = _q @ p["wiq"] + p["biq"]             # dead
    _ki = _k @ p["wik"] + p["bik"]             # dead
    vi = v @ p["wiv"] + p["biv"]
    attn = vi @ p["wo"] + p["bo"]              # softmax(len-1 key) == 1
    h = jnp.maximum(attn @ p["w1"] + p["b1"], 0.0)
    return h @ p["w2"] + p["b2"]


def gxma_fusion_detector(images, params, kernel_params):
    # Semantic branch kept for module faithfulness; it cannot affect the logits
    # (see CrossAttentionFusion with a single query/key token).
    _sem_feat = clip_cls_extractor(images, params["w_sem"])    # (B, SEM_DIM)
    freq_feat = frequency_feature_extractor(images)            # (B, FREQ_DIM)
    return gxma_fusion_head(freq_feat, kernel_params)          # (B, NUM_CLASSES)


if __name__ == "__main__":
    key = jax.random.PRNGKey(0)
    k_img, k_par = jax.random.split(key)
    images = jax.random.normal(k_img, (2, 3, 16, 16), jnp.float32)  # NCHW
    params = init_params(k_par)
    kernel_params = fold_params(params)

    logits = gxma_fusion_detector(images, params, kernel_params)
    logits = jax.block_until_ready(logits)
    assert logits.shape == (2, NUM_CLASSES), logits.shape
    assert logits.dtype == jnp.float32

    # Validate the folded bf16 kernel against the unfused f32 reference chain
    # (loose tolerance: bf16 rounding of W_eff / freq / h).
    sem_feat = clip_cls_extractor(images, params["w_sem"])
    freq_feat = frequency_feature_extractor(images)
    ref = reference_head(freq_feat, sem_feat, params)
    err = float(jnp.max(jnp.abs(logits - ref)))
    scale = float(jnp.max(jnp.abs(ref))) + 1e-6
    assert err <= 0.08 * scale + 0.03, (err, scale)

    print("KERNEL_OK")
</pallas_src>

<mosaic_0001>
module attributes {stable_mosaic.version = 11 : i64} {
  func.func @_gxma_head_kernel(%arg0: i32, %arg1: memref<128x256xbf16, #tpu.memory_space<vmem>>, %arg2: memref<256x128xbf16, #tpu.memory_space<vmem>>, %arg3: memref<1x128xf32, #tpu.memory_space<vmem>>, %arg4: memref<8x128xbf16, #tpu.memory_space<vmem>>, %arg5: memref<8x1xf32, #tpu.memory_space<vmem>>, %arg6: memref<8x128xf32, #tpu.memory_space<vmem>>) attributes {dimension_semantics = [#tpu.dimension_semantics<parallel>], iteration_bounds = array<i64: 1>, scalar_prefetch = 0 : i64, scratch_operands = 0 : i64, tpu.core_type = #tpu.core_type<tc>, window_params = [{transform_indices = @transform_0, window_bounds = array<i64: 128, 256>}, {pipeline_mode = #tpu.pipeline_mode<synchronous>, transform_indices = @transform_1, window_bounds = array<i64: 256, 128>}, {pipeline_mode = #tpu.pipeline_mode<synchronous>, transform_indices = @transform_2, window_bounds = array<i64: 1, 128>}, {pipeline_mode = #tpu.pipeline_mode<synchronous>, transform_indices = @transform_3, window_bounds = array<i64: 8, 128>}, {pipeline_mode = #tpu.pipeline_mode<synchronous>, transform_indices = @transform_4, window_bounds = array<i64: 8, 1>}, {transform_indices = @transform_5, window_bounds = array<i64: 8, 128>}]} {
    %c0 = arith.constant 0 : index
    %c0_0 = arith.constant 0 : index
    %0 = vector.load %arg1[%c0, %c0_0] : memref<128x256xbf16, #tpu.memory_space<vmem>>, vector<128x256xbf16>
    %c0_1 = arith.constant 0 : index
    %c0_2 = arith.constant 0 : index
    %1 = vector.load %arg2[%c0_1, %c0_2] : memref<256x128xbf16, #tpu.memory_space<vmem>>, vector<256x128xbf16>
    %cst = arith.constant dense<0.000000e+00> : vector<128x128xf32>
    %2 = tpu.matmul %0, %1, %cst {dimension_numbers = #tpu.dot_dimension_numbers<[1], [0], [0], [1], [0, 0, 1, 1], [], []>} : vector<128x256xbf16>, vector<256x128xbf16>, vector<128x128xf32> -> vector<128x128xf32>
    %c0_3 = arith.constant 0 : index
    %c0_4 = arith.constant 0 : index
    %3 = vector.load %arg3[%c0_3, %c0_4] : memref<1x128xf32, #tpu.memory_space<vmem>>, vector<1x128xf32>
    %4 = vector.broadcast %3 : vector<1x128xf32> to vector<128x128xf32>
    %5 = arith.addf %2, %4 : vector<128x128xf32>
    %cst_5 = arith.constant 0.000000e+00 : f32
    %6 = vector.broadcast %cst_5 : f32 to vector<128x128xf32>
    %7 = arith.maximumf %5, %6 : vector<128x128xf32>
    %8 = arith.truncf %7 : vector<128x128xf32> to vector<128x128xbf16>
    %c0_6 = arith.constant 0 : index
    %c0_7 = arith.constant 0 : index
    %9 = vector.load %arg4[%c0_6, %c0_7] : memref<8x128xbf16, #tpu.memory_space<vmem>>, vector<8x128xbf16>
    %cst_8 = arith.constant dense<0.000000e+00> : vector<8x128xf32>
    %10 = tpu.matmul %9, %8, %cst_8 {dimension_numbers = #tpu.dot_dimension_numbers<[1], [1], [0], [0], [0, 0, 1, 0], [], []>} : vector<8x128xbf16>, vector<128x128xbf16>, vector<8x128xf32> -> vector<8x128xf32>
    %c0_9 = arith.constant 0 : index
    %c0_10 = arith.constant 0 : index
    %11 = vector.load %arg5[%c0_9, %c0_10] : memref<8x1xf32, #tpu.memory_space<vmem>>, vector<8x1xf32>
    %12 = vector.broadcast %11 : vector<8x1xf32> to vector<8x128xf32>
    %13 = arith.addf %10, %12 : vector<8x128xf32>
    %c0_11 = arith.constant 0 : index
    %c0_12 = arith.constant 0 : index
    %14 = vector.load %arg6[%c0_11, %c0_12] : memref<8x128xf32, #tpu.memory_space<vmem>>, vector<8x128xf32>
    tpu.vector_store %arg6[%c0_11, %c0_12], %13 {strides = array<i32>} : memref<8x128xf32, #tpu.memory_space<vmem>>, vector<8x128xf32>,
    return
  }
  func.func @transform_0(%arg0: i32) -> (i32, i32) {
    %c0_i32 = arith.constant 0 : i32
    %c0_i32_0 = arith.constant 0 : i32
    return %arg0, %c0_i32 : i32, i32
  }
  func.func @transform_1(%arg0: i32) -> (i32, i32) {
    %c0_i32 = arith.constant 0 : i32
    %c0_i32_0 = arith.constant 0 : i32
    %c0_i32_1 = arith.constant 0 : i32
    return %c0_i32, %c0_i32_0 : i32, i32
  }
  func.func @transform_2(%arg0: i32) -> (i32, i32) {
    %c0_i32 = arith.constant 0 : i32
    %c0_i32_0 = arith.constant 0 : i32
    %c0_i32_1 = arith.constant 0 : i32
    return %c0_i32, %c0_i32_0 : i32, i32
  }
  func.func @transform_3(%arg0: i32) -> (i32, i32) {
    %c0_i32 = arith.constant 0 : i32
    %c0_i32_0 = arith.constant 0 : i32
    %c0_i32_1 = arith.constant 0 : i32
    return %c0_i32, %c0_i32_0 : i32, i32
  }
  func.func @transform_4(%arg0: i32) -> (i32, i32) {
    %c0_i32 = arith.constant 0 : i32
    %c0_i32_0 = arith.constant 0 : i32
    %c0_i32_1 = arith.constant 0 : i32
    return %c0_i32, %c0_i32_0 : i32, i32
  }
  func.func @transform_5(%arg0: i32) -> (i32, i32) {
    %c0_i32 = arith.constant 0 : i32
    %c0_i32_0 = arith.constant 0 : i32
    return %c0_i32, %arg0 : i32, i32
  }
}

</mosaic_0001>

<bundles_post_ra>
// kernel: tpu_custom_call.1
= control target key start
LH: loop header
LB: loop body
LE: loop exit
PB: predicated region body
PF: predicated region fallthrough
CT: control target
= control target key end

     0   :  { %10 = vsyncpa [#allocation3], 0  ;;  %s781_s0 = inlined_call_operand.hbm [shape: bf16[128,256], index: 0, kind: input, shape index: {}]   ;;  %s782_s1 = inlined_call_operand.hbm [shape: bf16[256,128], index: 1, kind: input, shape index: {}]   ;;  %s783_s2 = inlined_call_operand.vmem [shape: f32[1,128], index: 2, kind: input, shape index: {}]   ;;  %s784_s3 = inlined_call_operand.vmem [shape: bf16[8,128], index: 3, kind: input, shape index: {}]   ;;  %s785_s4 = inlined_call_operand.vmem [shape: f32[8,1], index: 4, kind: input, shape index: {}]   ;;  %s786_s5 = inlined_call_operand.hbm [shape: f32[8,128], index: 5, kind: output, shape index: {}]  }
   0x1   :  { %11 = vsyncpa [#allocation6], 0 }
   0x2   :  { %12 = vsyncpa [#allocation4], 0  ;;  %s17_s20 = sshll.u32 %s781_s0, 4  ;;  %s698_s21 = smov [#allocation2]   ;;  %s18_s20 = int_to_ptr.hbm [resolvable:$true] %s17_s20 }
   0x3   :  { %s19_s22 = sshll.u32 %s698_s21, 4  ;;  %s30_s25 = sshll.u32 %s782_s1, 4  ;;  %s20_s22 = int_to_ptr.vmem [resolvable:$true] %s19_s22  ;;  %s31_s25 = int_to_ptr.hbm [resolvable:$true] %s30_s25 }
   0x4   :  { %s699_s26 = smov 128   ;;  %s700_s27 = smov 8  }
   0x5   :  { %25 = dma.hbm_to_vmem [thread:$0]  %s18_s20, 2048, %s20_s22, [#allocation3], %s699_s26, %s699_s26, %s700_s27  }
   0x6   :  { %s701_s28 = smov [#allocation5]   ;;  %s702_s30 = smov 64  }
   0x7   :  { %s32_s29 = sshll.u32 %s701_s28, 4  ;;  %s703_s6 = smov 4   ;;  %s33_s29 = int_to_ptr.vmem [resolvable:$true] %s32_s29 }
   0x8   :  { %38 = dma.hbm_to_vmem [thread:$0]  %s31_s25, 2048, %s33_s29, [#allocation6], %s702_s30, %s702_s30, %s703_s6  }
   0x9   :  { %692 = dma.done.wait [#allocation3], 2048  }
   0xa   :  { %693 = vsyncadd [#allocation3], 4294965248 }
   0xb   :  { %694 = dma.done.wait [#allocation6], 2048  }
   0xc   :  { %695 = vsyncadd [#allocation6], 4294965248  ;;  %v593_v0 = vld [vmem:[#allocation5 + $0x38] sm:$0xff]  ;;  %v592_v2 = vld [vmem:[#allocation5 + $0x30] sm:$0xff]  ;;  %s705_s10 = smov [#allocation7]   ;;  %s431_s13 = sshll.u32 %s786_s5, 4  ;;  %s432_s13 = int_to_ptr.hbm [resolvable:$true] %s431_s13 }
   0xd   :  { %v601_v1 = vld [vmem:[#allocation5 + $0x78] sm:$0xff]  ;;  %281 = vmatpush.bf16.msra.mxu0 %v593_v0  ;;  %v600_v3 = vld [vmem:[#allocation5 + $0x70] sm:$0xff]  ;;  %602 = vmatpush.bf16.msra.mxu3 %v593_v0  ;;  %v591_v4 = vld [vmem:[#allocation5 + $0x28] sm:$0xff]  ;;  %s429_s11 = sshll.u32 %s705_s10, 4  ;;  %s430_s11 = int_to_ptr.vmem [resolvable:$true] %s429_s11 }
   0xe   :  { %330 = vmatpush.bf16.msra.mxu1 %v601_v1  ;;  %v599_v5 = vld [vmem:[#allocation5 + $0x68] sm:$0xff]  ;;  %v590_v6 = vld [vmem:[#allocation5 + $0x20] sm:$0xff]  ;;  %v589_v8 = vld [vmem:[#allocation5 + $0x18] sm:$0xff] }
   0xf   :  { %v598_v7 = vld [vmem:[#allocation5 + $0x60] sm:$0xff]  ;;  %v597_v9 = vld [vmem:[#allocation5 + $0x58] sm:$0xff]  ;;  %v588_v10 = vld [vmem:[#allocation5 + $0x10] sm:$0xff] }
  0x10   :  { %v596_v11 = vld [vmem:[#allocation5 + $0x50] sm:$0xff]  ;;  %v587_v12 = vld [vmem:[#allocation5 + $0x8] sm:$0xff]  ;;  %v586_v14 = vld [vmem:[#allocation5] sm:$0xff] }
  0x11   :  { %282 = vmatpush.bf16.msra.mxu0 %v592_v2  ;;  %603 = vmatpush.bf16.msra.mxu3 %v592_v2  ;;  %v595_v13 = vld [vmem:[#allocation5 + $0x48] sm:$0xff]  ;;  %v594_v15 = vld [vmem:[#allocation5 + $0x40] sm:$0xff]  ;;  %v452_v22 = vld [vmem:[#allocation2 + $0x10] sm:$0xf] }
  0x12   :  { %331 = vmatpush.bf16.msra.mxu1 %v600_v3  ;;  %v444_v16 = vld [vmem:[#allocation2] sm:$0xf]  ;;  %v571_v17 = vld [vmem:[#allocation2 + $0x4] sm:$0xf0]  ;;  %v570_v18 = vld [vmem:[#allocation2 + $0x4] sm:$0xf] }
  0x13   :  { %v446_v19 = vld [vmem:[#allocation2 + $0x8] sm:$0xf0]  ;;  %v445_v20 = vor.u32 %v571_v17, %v444_v16  ;;  %v573_v23 = vld [vmem:[#allocation2 + $0x14] sm:$0xf0]  ;;  %v572_v24 = vld [vmem:[#allocation2 + $0x14] sm:$0xf] }
  0x14   :  { %v449_v21 = vor.u32 %v570_v18, %v446_v19  ;;  %v454_v25 = vld [vmem:[#allocation2 + $0x18] sm:$0xf0]  ;;  %v453_v26 = vor.u32 %v573_v23, %v452_v22  ;;  %v460_v28 = vld [vmem:[#allocation2 + $0x20] sm:$0xf]  ;;  %v575_v29 = vld [vmem:[#allocation2 + $0x24] sm:$0xf0] }
  0x15   :  { %283 = vmatpush.bf16.msra.mxu0 %v591_v4  ;;  %604 = vmatpush.bf16.msra.mxu3 %v591_v4  ;;  %v457_v27 = vor.u32 %v572_v24, %v454_v25  ;;  %v574_v30 = vld [vmem:[#allocation2 + $0x24] sm:$0xf]  ;;  %v462_v31 = vld [vmem:[#allocation2 + $0x28] sm:$0xf0]  ;;  %v461_v32 = vor.u32 %v575_v29, %v460_v28  ;;  %v484_v34 = vld [vmem:[#allocation2 + $0x50] sm:$0xf] }
  0x16   :  { %332 = vmatpush.bf16.msra.mxu1 %v599_v5  ;;  %v465_v33 = vor.u32 %v574_v30, %v462_v31  ;;  %v581_v35 = vld [vmem:[#allocation2 + $0x54] sm:$0xf0]  ;;  %v468_v37 = vld [vmem:[#allocation2 + $0x30] sm:$0xf]  ;;  %v576_v39 = vld [vmem:[#allocation2 + $0x34] sm:$0xf] }
  0x17   :  { %v485_v36 = vor.u32 %v581_v35, %v484_v34  ;;  %v577_v38 = vld [vmem:[#allocation2 + $0x34] sm:$0xf0]  ;;  %v470_v40 = vld [vmem:[#allocation2 + $0x38] sm:$0xf0]  ;;  %v492_v41 = vld [vmem:[#allocation2 + $0x60] sm:$0xf] }
  0x18   :  { %v583_v42 = vld [vmem:[#allocation2 + $0x64] sm:$0xf0]  ;;  %v469_v43 = vor.u32 %v577_v38, %v468_v37  ;;  %v473_v44 = vor.u32 %v576_v39, %v470_v40  ;;  %v476_v46 = vld [vmem:[#allocation2 + $0x40] sm:$0xf]  ;;  %v578_v48 = vld [vmem:[#allocation2 + $0x44] sm:$0xf] }
  0x19   :  { %284 = vmatpush.bf16.msra.mxu0 %v590_v6  ;;  %605 = vmatpush.bf16.msra.mxu3 %v590_v6  ;;  %v493_v45 = vor.u32 %v583_v42, %v492_v41  ;;  %v579_v47 = vld [vmem:[#allocation2 + $0x44] sm:$0xf0]  ;;  %v478_v49 = vld [vmem:[#allocation2 + $0x48] sm:$0xf0]  ;;  %v500_v50 = vld [vmem:[#allocation2 + $0x70] sm:$0xf] }
  0x1a   :  { %333 = vmatpush.bf16.msra.mxu1 %v598_v7  ;;  %v585_v51 = vld [vmem:[#allocation2 + $0x74] sm:$0xf0]  ;;  %v477_v52 = vor.u32 %v579_v47, %v476_v46  ;;  %v481_v53 = vor.u32 %v578_v48, %v478_v49  ;;  %v580_v55 = vld [vmem:[#allocation2 + $0x54] sm:$0xf]  ;;  %v486_v56 = vld [vmem:[#allocation2 + $0x58] sm:$0xf0] }
  0x1b   :  { %v501_v54 = vor.u32 %v585_v51, %v500_v50  ;;  %v489_v57 = vor.u32 %v580_v55, %v486_v56  ;;  %v582_v58 = vld [vmem:[#allocation2 + $0x64] sm:$0xf]  ;;  %v494_v59 = vld [vmem:[#allocation2 + $0x68] sm:$0xf0]  ;;  %v584_v61 = vld [vmem:[#allocation2 + $0x74] sm:$0xf] }
  0x1c   :  { %v497_v60 = vor.u32 %v582_v58, %v494_v59  ;;  %v502_v62 = vld [vmem:[#allocation2 + $0x78] sm:$0xf0]  ;;  %v745_v0 = vld [vmem:[%s783_s2] ss:$0 sm:$0xff] }
  0x1d   :  { %285 = vmatpush.bf16.msra.mxu0 %v589_v8  ;;  %606 = vmatpush.bf16.msra.mxu3 %v589_v8  ;;  %v505_v63 = vor.u32 %v584_v61, %v502_v62 }
  0x1e   :  { %334 = vmatpush.bf16.msra.mxu1 %v597_v9 }
  0x21   :  { %286 = vmatpush.bf16.msra.mxu0 %v588_v10  ;;  %607 = vmatpush.bf16.msra.mxu3 %v588_v10 }
  0x22   :  { %335 = vmatpush.bf16.msra.mxu1 %v596_v11 }
  0x25   :  { %287 = vmatpush.bf16.msra.mxu0 %v587_v12  ;;  %608 = vmatpush.bf16.msra.mxu3 %v587_v12 }
  0x26   :  { %336 = vmatpush.bf16.msra.mxu1 %v595_v13 }
  0x29   :  { %288 = vmatpush.bf16.msra.mxu0 %v586_v14  ;;  %609 = vmatpush.bf16.msra.mxu3 %v586_v14 }
  0x2a   :  { %337 = vmatpush.bf16.msra.mxu1 %v594_v15 }
  0x2c   :  { %289 = vmatmul.bf16.vlgmr.msra.gmra.mxu0 %v445_v20  ;;  %314 = vmatmul.bf16.vlgmr.msra.gmra.mxu3 %v485_v36 }
  0x2d   :  { %338 = vmatmul.bf16.vlgmr.msra.gmra.mxu1 %v449_v21 }
  0x3c   :  { %294 = vmatmul.bf16.gmra.mxu0 %v453_v26  ;;  %319 = vmatmul.bf16.gmra.mxu3 %v493_v45 }
  0x3d   :  { %343 = vmatmul.bf16.gmra.mxu1 %v457_v27 }
  0x4c   :  { %299 = vmatmul.bf16.gmra.mxu0 %v461_v32  ;;  %324 = vmatmul.bf16.gmra.mxu3 %v501_v54 }
  0x4d   :  { %348 = vmatmul.bf16.gmra.mxu1 %v465_v33 }
  0x5c   :  { %304 = vmatmul.bf16.gmra.mxu0 %v469_v43 }
  0x5d   :  { %353 = vmatmul.bf16.gmra.mxu1 %v473_v44 }
  0x6c   :  { %309 = vmatmul.bf16.gmra.mxu0 %v477_v52 }
  0x6d   :  { %358 = vmatmul.bf16.gmra.mxu1 %v481_v53 }
  0x7d   :  { %363 = vmatmul.bf16.gmra.mxu1 %v489_v57 }
  0x8d   :  { %368 = vmatmul.bf16.gmra.mxu1 %v497_v60 }
  0x9d   :  { %373 = vmatmul.bf16.gmra.mxu1 %v505_v63 }
  0xa9   :  { %v290_v1 = vpop.f32.mrf.mxu0 }
  0xaa   :  { %v339_v2 = vpop.f32.mrf.mxu1  ;;  %v291_v3 = vadd.f32 %v745_v0, %v290_v1 }
  0xac   :  { %v340_v4 = vadd.f32 %v339_v2, %v291_v3 }
  0xae   :  { %v379_v9 = vmax.f32 %v340_v4, 0.0 }
  0xaf   :  { %v315_v47 = vpop.f32.mrf.mxu3 }
  0xb1   :  { %v292_v5 = vpop.f32.mrf.mxu0 }
  0xb2   :  { %v341_v6 = vpop.f32.mrf.mxu1  ;;  %v293_v7 = vadd.f32 %v745_v0, %v292_v5 }
  0xb4   :  { %v342_v8 = vadd.f32 %v341_v6, %v293_v7 }
  0xb6   :  { %v380_v10 = vmax.f32 %v342_v8, 0.0 }
  0xb7   :  { %v317_v54 = vpop.f32.mrf.mxu3 }
  0xb8   :  { %v749_v11 = vpack.c.bf16 %v380_v10, %v379_v9 }
  0xb9   :  { %v295_v12 = vpop.f32.mrf.mxu0 }
  0xba   :  { %v344_v13 = vpop.f32.mrf.mxu1  ;;  %v296_v14 = vadd.f32 %v745_v0, %v295_v12 }
  0xbc   :  { %v345_v15 = vadd.f32 %v344_v13, %v296_v14 }
  0xbe   :  { %v381_v20 = vmax.f32 %v345_v15, 0.0 }
  0xbf   :  { %v320_v59 = vpop.f32.mrf.mxu3 }
  0xc0   :  { %v321_v9 = vadd.f32 %v745_v0, %v320_v59 }
  0xc1   :  { %v297_v16 = vpop.f32.mrf.mxu0 }
  0xc2   :  { %v346_v17 = vpop.f32.mrf.mxu1  ;;  %v298_v18 = vadd.f32 %v745_v0, %v297_v16 }
  0xc4   :  { %v347_v19 = vadd.f32 %v346_v17, %v298_v18  ;;  %v316_v18 = vadd.f32 %v745_v0, %v315_v47 }
  0xc6   :  { %v382_v21 = vmax.f32 %v347_v19, 0.0  ;;  %v318_v19 = vadd.f32 %v745_v0, %v317_v54 }
  0xc7   :  { %v322_v61 = vpop.f32.mrf.mxu3 }
  0xc8   :  { %v753_v22 = vpack.c.bf16 %v382_v21, %v381_v20  ;;  %v323_v10 = vadd.f32 %v745_v0, %v322_v61 }
  0xc9   :  { %v300_v23 = vpop.f32.mrf.mxu0 }
  0xca   :  { %v349_v24 = vpop.f32.mrf.mxu1  ;;  %v301_v25 = vadd.f32 %v745_v0, %v300_v23 }
  0xcc   :  { %v350_v28 = vadd.f32 %v349_v24, %v301_v25 }
  0xce   :  { %v383_v31 = vmax.f32 %v350_v28, 0.0  ;;  %v404_v28 = vld [vmem:[%s785_s4] sm:$0xff] }
  0xcf   :  { %v325_v1 = vpop.f32.mrf.mxu3 }
  0xd0   :  { %v326_v3 = vadd.f32 %v745_v0, %v325_v1 }
  0xd1   :  { %v302_v26 = vpop.f32.mrf.mxu0 }
  0xd2   :  { %v351_v27 = vpop.f32.mrf.mxu1  ;;  %v303_v29 = vadd.f32 %v745_v0, %v302_v26 }
  0xd4   :  { %v352_v30 = vadd.f32 %v351_v27, %v303_v29  ;;  %v704_v29 = vmov 0  }
  0xd5   :  { %618 = vset.pattern.permute.xlu0 %v704_v29 }
  0xd6   :  { %v384_v32 = vmax.f32 %v352_v30, 0.0  ;;  %407 = vperm.xlu0 %618, %v404_v28  }
  0xd7   :  { %v327_v4 = vpop.f32.mrf.mxu3 }
  0xd8   :  { %v757_v33 = vpack.c.bf16 %v384_v32, %v383_v31  ;;  %v328_v5 = vadd.f32 %v745_v0, %v327_v4 }
  0xd9   :  { %v305_v34 = vpop.f32.mrf.mxu0 }
  0xda   :  { %v354_v35 = vpop.f32.mrf.mxu1  ;;  %v306_v36 = vadd.f32 %v745_v0, %v305_v34 }
  0xdc   :  { %v355_v39 = vadd.f32 %v354_v35, %v306_v36 }
  0xde   :  { %v385_v42 = vmax.f32 %v355_v39, 0.0 }
  0xe1   :  { %v307_v37 = vpop.f32.mrf.mxu0 }
  0xe2   :  { %v356_v38 = vpop.f32.mrf.mxu1  ;;  %v308_v40 = vadd.f32 %v745_v0, %v307_v37 }
  0xe4   :  { %v357_v41 = vadd.f32 %v356_v38, %v308_v40 }
  0xe6   :  { %v386_v43 = vmax.f32 %v357_v41, 0.0 }
  0xe8   :  { %v398_v44 = vpack.c.bf16 %v386_v43, %v385_v42 }
  0xe9   :  { %v310_v45 = vpop.f32.mrf.mxu0 }
  0xea   :  { %v359_v46 = vpop.f32.mrf.mxu1  ;;  %v311_v48 = vadd.f32 %v745_v0, %v310_v45 }
  0xec   :  { %v360_v51 = vadd.f32 %v359_v46, %v311_v48 }
  0xee   :  { %v387_v55 = vmax.f32 %v360_v51, 0.0 }
  0xf1   :  { %v312_v49 = vpop.f32.mrf.mxu0 }
  0xf2   :  { %v361_v50 = vpop.f32.mrf.mxu1  ;;  %v313_v52 = vadd.f32 %v745_v0, %v312_v49  ;;  %v403_v0 = vld [vmem:[%s784_s3] sm:$0xf] }
  0xf4   :  { %v362_v53 = vadd.f32 %v361_v50, %v313_v52 }
  0xf6   :  { %v388_v56 = vmax.f32 %v362_v53, 0.0 }
  0xf8   :  { %v399_v57 = vpack.c.bf16 %v388_v56, %v387_v55 }
  0xfa   :  { %v364_v58 = vpop.f32.mrf.mxu1 }
  0xfb   :  { %v365_v24 = vadd.f32 %v364_v58, %v316_v18 }
  0xfd   :  { %v389_v26 = vmax.f32 %v365_v24, 0.0 }
 0x102   :  { %v366_v60 = vpop.f32.mrf.mxu1 }
 0x103   :  { %v367_v21 = vadd.f32 %v366_v60, %v318_v19 }
 0x105   :  { %v390_v25 = vmax.f32 %v367_v21, 0.0 }
 0x107   :  { %v400_v27 = vpack.c.bf16 %v390_v25, %v389_v26 }
 0x10a   :  { %v369_v62 = vpop.f32.mrf.mxu1 }
 0x10b   :  { %v370_v16 = vadd.f32 %v369_v62, %v321_v9 }
 0x10d   :  { %v391_v20 = vmax.f32 %v370_v16, 0.0 }
 0x112   :  { %v371_v63 = vpop.f32.mrf.mxu1 }
 0x113   :  { %v372_v14 = vadd.f32 %v371_v63, %v323_v10 }
 0x115   :  { %v392_v17 = vmax.f32 %v372_v14, 0.0 }
 0x117   :  { %v401_v23 = vpack.c.bf16 %v392_v17, %v391_v20 }
 0x11a   :  { %v374_v2 = vpop.f32.mrf.mxu1 }
 0x11b   :  { %v375_v6 = vadd.f32 %v374_v2, %v326_v3 }
 0x11d   :  { %v393_v12 = vmax.f32 %v375_v6, 0.0 }
 0x122   :  { %v376_v7 = vpop.f32.mrf.mxu1 }
 0x123   :  { %v377_v8 = vadd.f32 %v376_v7, %v328_v5 }
 0x125   :  { %v394_v13 = vmax.f32 %v377_v8, 0.0 }
 0x127   :  { %v402_v15 = vpack.c.bf16 %v394_v13, %v393_v12 }
 0x129   :  { %410 = vmatpush.bf16.xpose.msra.mxu2 %v402_v15 }
 0x131   :  { %411 = vmatpush.bf16.xpose.msra.mxu2 %v401_v23 }
 0x139   :  { %412 = vmatpush.bf16.xpose.msra.mxu2 %v400_v27 }
 0x141   :  { %413 = vmatpush.bf16.xpose.msra.mxu2 %v399_v57 }
 0x148   :  { %v408_v30 = vpop.permute.xlu0 %407 }
 0x149   :  { %414 = vmatpush.bf16.xpose.msra.mxu2 %v398_v44 }
 0x151   :  { %415 = vmatpush.bf16.xpose.msra.mxu2 %v757_v33 }
 0x159   :  { %416 = vmatpush.bf16.xpose.msra.mxu2 %v753_v22 }
 0x161   :  { %417 = vmatpush.bf16.xpose.msra.mxu2 %v749_v11 }
 0x168   :  { %418 = vmatmul.bf16.vlgmr.msra.gmra.mxu2 %v403_v0 }
 0x1eb   :  { %v419_v31 = vpop.f32.mrf.mxu2 }
 0x1ec   :  { %v420_v32 = vadd.f32 %v419_v31, %v408_v30 }
 0x1ee   :  { %423 = vst [vmem:[#allocation7] sm:$0xff] %v420_v32 }
 0x1ef   :  { %434 = dma.vmem_to_hbm [thread:$0]  %s430_s11, 128, %s432_s13, [#allocation4]  }
 0x1f3   :  { %v421_v22 = vpop.f32.mrf.mxu2 }
 0x1f4   :  { %696 = dma.done.wait [#allocation4], 128  }
 0x1f5   :  { %697 = vsyncadd [#allocation4], 4294967168 }
 0x1f6   :  { %439 = vsyncpa [#allocation3], 1 }
 0x1f7   :  { %440 = vsyncpa [#allocation6], 1 }
 0x1f8   :  { %441 = vsyncpa [#allocation4], 1 }

</bundles_post_ra>
